<compile_context>
chip_gen: v7x
topology: tpu7x:2x2x1
jax: 0.10.0
libtpu: 0.0.40
codegen_flags: <defaults>
</compile_context>

<pallas_src>
import functools
import math

import jax
import jax.numpy as jnp
from jax.experimental import pallas as pl
from jax.experimental.pallas import tpu as pltpu


SLACK = 1e-4
_SUPPORTED_ACTS = (None, "relu", "tanh")   # all map 0 -> 0, so zero-padding is exact


def _round_up(x, m):
    return ((x + m - 1) // m) * m


def _tpu_vmem_and_cores():
    """Best-effort per-chip VMEM capacity and TensorCore count."""
    vmem = 64 * 1024 * 1024        # conservative fallback (v7x per-TC VMEM)
    cores = 1
    try:
        info = pltpu.get_tpu_info()
        vmem = int(getattr(info, "vmem_capacity_bytes", vmem)) or vmem
        for attr in ("num_tensorcores", "tensorcores_per_chip", "num_cores"):
            v = getattr(info, attr, None)
            if v:
                cores = int(v)
                break
    except Exception:
        pass
    return vmem, max(1, cores)


@functools.lru_cache(maxsize=1)
def _buffered_supported():
    """Probe: does this backend accept pipeline_mode=pl.Buffered(1)?"""
    try:
        def _k(c_ref, x_ref, o_ref):
            o_ref[...] = x_ref[...] + c_ref[...]

        x = jnp.zeros((16, 128), jnp.float32)
        c = jnp.ones((1, 128), jnp.float32)
        out = pl.pallas_call(
            _k,
            out_shape=jax.ShapeDtypeStruct((16, 128), jnp.float32),
            grid=(2,),
            in_specs=[pl.BlockSpec((1, 128), lambda i: (0, 0),
                                   pipeline_mode=pl.Buffered(1)),
                      pl.BlockSpec((8, 128), lambda i: (i, 0))],
            out_specs=pl.BlockSpec((8, 128), lambda i: (i, 0)),
        )(c, x)
        jax.block_until_ready(out)
        return bool(jnp.allclose(out, 1.0))
    except Exception:
        return False


# --------------------------------------------------------------------------
# Pallas kernels
# --------------------------------------------------------------------------
def _mlp_kernel(*refs, activations):
    """Fused feed-forward stack for one batch tile.

    refs = (x_ref, w0_ref, b0_ref, w1_ref, b1_ref, ..., out_ref)
    x and weights are in the matmul dtype (bf16 by default); the MXU
    accumulates in f32; bias adds and ReLU/Tanh run in f32.
    """
    x_ref = refs[0]
    out_ref = refs[-1]
    wb_refs = refs[1:-1]

    h = x_ref[...]                                   # matmul dtype
    for li, act in enumerate(activations):
        w = wb_refs[2 * li][...]                     # (in_pad, out_pad)
        b = wb_refs[2 * li + 1][...]                 # (1, out_pad), f32
        h = jnp.dot(h.astype(w.dtype), w,
                    preferred_element_type=jnp.float32) + b
        if act == "relu":
            h = jnp.maximum(h, 0.0)
        elif act == "tanh":
            h = jnp.tanh(h)
        elif act is not None:
            raise ValueError(f"unsupported activation: {act}")
    out_ref[...] = h.astype(out_ref.dtype)


def _var_diag_kernel(s_ref, mask_ref, o_ref, *, slack):
    """Batched diag-embed of the variances, stored lane-dense.

    s_ref:    (tb, T*L)    log-sds (f32).
    mask_ref: (1, T*T*L)   precomputed block-diagonal {0,1} mask (resident).
    o_ref:    (tb, T*T*L)  with o[b, i*T*L + j*L + l]
              = (exp(2*s[b, i*L + l]) + slack) * (i == j)
              == corr_sds[b, i, j, l] flattened over (i, j, l).
    """
    var = jnp.exp(2.0 * s_ref[...]) + slack                  # (tb, T*L)
    T = o_ref.shape[-1] // s_ref.shape[-1]
    var_rep = jnp.concatenate([var] * T, axis=-1)            # (tb, T*T*L)
    o_ref[...] = (var_rep * mask_ref[...]).astype(o_ref.dtype)


# --------------------------------------------------------------------------
# Wrapper module
# --------------------------------------------------------------------------
class FeedforwardVAEEncoderPallas:
    def __init__(self, layers_list, latent_dims, observed_dims, timesteps, key,
                 matmul_dtype=jnp.bfloat16):
        # matmul_dtype=jnp.float32 is available if exact f32 parity with the
        # original torch module is required.
        self.slack = SLACK
        self.timesteps = timesteps
        self.latent_dims = latent_dims
        self.observed_dims = observed_dims
        self.flattened_input_dims = observed_dims * timesteps
        self.flattened_output_dims = latent_dims * timesteps * 2
        self.matmul_dtype = jnp.dtype(matmul_dtype)

        vmem, cores = _tpu_vmem_and_cores()
        self._num_cores = cores
        self._vmem_budget = int(vmem * 0.70)
        self._vmem_limit = int(vmem * 0.80)
        self._use_buffered = _buffered_supported()

        dims = ([self.flattened_input_dims]
                + [size for size, _ in layers_list]
                + [self.flattened_output_dims])
        self.activations = tuple([act for _, act in layers_list] + [None])
        # Zero-padding exactness requires activations with f(0) == 0.
        for act in self.activations:
            if act not in _SUPPORTED_ACTS:
                raise ValueError(f"unsupported activation for padded kernel: {act}")
        # Lane-friendly padded feature dims (multiples of 128).
        self.padded_dims = [_round_up(d, 128) for d in dims]

        self.params = []          # unpadded f32 (w, b) — reference numerics
        self.padded_params = []   # padded (w in matmul dtype, b in f32)
        for li in range(len(dims) - 1):
            in_dim, out_dim = dims[li], dims[li + 1]
            pin, pout = self.padded_dims[li], self.padded_dims[li + 1]
            key, kw, kb = jax.random.split(key, 3)
            bound = 1.0 / math.sqrt(in_dim)
            w = jax.random.uniform(kw, (in_dim, out_dim), jnp.float32,
                                   minval=-bound, maxval=bound)
            b = jax.random.uniform(kb, (1, out_dim), jnp.float32,
                                   minval=-bound, maxval=bound)
            self.params.append((w, b))
            wp = jnp.pad(w, ((0, pin - in_dim), (0, pout - out_dim)))
            bp = jnp.pad(b, ((0, 0), (0, pout - out_dim)))
            self.padded_params.append((wp.astype(self.matmul_dtype),
                                       bp.astype(jnp.float32)))

        self._weight_bytes = int(sum(w.size * w.dtype.itemsize
                                     + b.size * b.dtype.itemsize
                                     for w, b in self.padded_params))

        # Block-diagonal mask for the diag-embed kernel (batch-invariant,
        # computed once here, passed as a resident input to the kernel).
        T, L = timesteps, latent_dims
        eye = jnp.eye(T, dtype=jnp.float32)
        self._diag_mask = (eye[:, :, None]
                           * jnp.ones((1, 1, L), jnp.float32)).reshape(1, T * T * L)

    # ---------------- tile selection ----------------
    def _choose_tile_b(self, B):
        in_pad, out_pad = self.padded_dims[0], self.padded_dims[-1]
        max_pad = max(self.padded_dims)
        in_itemsize = jnp.dtype(self.matmul_dtype).itemsize
        Bp8 = _round_up(max(B, 1), 8)
        # >=1 grid step per TensorCore when the chip has >1 TC (v7x megacore);
        # otherwise the fewest possible steps (best on single-TC v5e/v6e).
        cap = _round_up(pl.cdiv(Bp8, self._num_cores), 8)
        cands = sorted({c for c in
                        (cap, 2048, 1024, 512, 256, 128, 64, 32, 16, 8)
                        if c <= cap}, reverse=True)
        # Conservative accounting: weights counted double even though
        # Buffered(1) (when supported) keeps only one copy resident.
        for tb in cands:
            io_bytes = 2 * tb * (in_itemsize * in_pad + 4 * out_pad)  # pipelined x/out
            act_bytes = 4 * 4 * tb * max_pad                          # f32 intermediates
            if 2 * self._weight_bytes + io_bytes + act_bytes <= self._vmem_budget:
                return tb
        raise NotImplementedError(
            "Resident layer weights exceed the VMEM budget; "
            "TODO(synk): split the first layer over a K grid axis.")

    def _choose_tile_diag(self, B):
        T, L = self.timesteps, self.latent_dims
        Bp8 = _round_up(max(B, 1), 8)
        # f32 in/out double buffers + one f32 temp per row.
        row_bytes = 2 * 4 * (T * L + T * T * L) + 4 * T * T * L
        max_rows = max(8, (self._vmem_budget // max(row_bytes, 1)) // 8 * 8)
        return max(8, min(Bp8, max_rows, 2048))

    # ---------------- pallas_call builders ----------------
    def _mlp_call(self, Bp, tile_b, use_buffered):
        in_pad, out_pad = self.padded_dims[0], self.padded_dims[-1]
        res_kw = ({"pipeline_mode": pl.Buffered(1)} if use_buffered else {})

        in_specs = [pl.BlockSpec((tile_b, in_pad), lambda i: (i, 0))]
        for w, b in self.padded_params:
            in_specs.append(pl.BlockSpec(w.shape, lambda i: (0, 0), **res_kw))
            in_specs.append(pl.BlockSpec(b.shape, lambda i: (0, 0), **res_kw))

        flops = 2 * Bp * sum(self.padded_dims[i] * self.padded_dims[i + 1]
                             for i in range(len(self.padded_dims) - 1))
        transcendentals = Bp * sum(self.padded_dims[i + 1]
                                   for i, a in enumerate(self.activations)
                                   if a == "tanh")
        in_itemsize = jnp.dtype(self.matmul_dtype).itemsize
        bytes_accessed = (in_itemsize * Bp * in_pad + 4 * Bp * out_pad
                          + self._weight_bytes)

        return pl.pallas_call(
            functools.partial(_mlp_kernel, activations=self.activations),
            out_shape=jax.ShapeDtypeStruct((Bp, out_pad), jnp.float32),
            grid=(Bp // tile_b,),
            in_specs=in_specs,
            out_specs=pl.BlockSpec((tile_b, out_pad), lambda i: (i, 0)),
            compiler_params=pltpu.CompilerParams(
                dimension_semantics=("parallel",),
                vmem_limit_bytes=self._vmem_limit),
            cost_estimate=pl.CostEstimate(
                flops=int(flops),
                transcendentals=int(transcendentals),
                bytes_accessed=int(bytes_accessed)),
        )

    def _diag_call(self, Bp2, tile_d, use_buffered):
        T, L = self.timesteps, self.latent_dims
        res_kw = ({"pipeline_mode": pl.Buffered(1)} if use_buffered else {})
        return pl.pallas_call(
            functools.partial(_var_diag_kernel, slack=self.slack),
            out_shape=jax.ShapeDtypeStruct((Bp2, T * T * L), jnp.float32),
            grid=(Bp2 // tile_d,),
            in_specs=[pl.BlockSpec((tile_d, T * L), lambda i: (i, 0)),
                      pl.BlockSpec((1, T * T * L), lambda i: (0, 0), **res_kw)],
            out_specs=pl.BlockSpec((tile_d, T * T * L), lambda i: (i, 0)),
            compiler_params=pltpu.CompilerParams(
                dimension_semantics=("parallel",),
                vmem_limit_bytes=self._vmem_limit),
            cost_estimate=pl.CostEstimate(
                flops=int(2 * Bp2 * T * T * L),
                transcendentals=int(Bp2 * T * L),
                bytes_accessed=int(4 * Bp2 * (T * L + T * T * L))),
        )

    # ---------------- forward ----------------
    def __call__(self, X):
        B = X.shape[0]
        T, L = self.timesteps, self.latent_dims
        in_dim = self.flattened_input_dims
        out_dim = self.flattened_output_dims
        in_pad = self.padded_dims[0]

        tile_b = self._choose_tile_b(B)
        Bp = _round_up(max(B, 1), tile_b)

        # torch.flatten(X, 1); streamed in the matmul dtype (bf16 by default),
        # zero-padded to (Bp, in_pad).
        x_flat = X.reshape(B, -1).astype(self.matmul_dtype)
        x_pad = jnp.pad(x_flat, ((0, Bp - B), (0, in_pad - in_dim)))

        args = [x_pad]
        for w, b in self.padded_params:
            args.extend([w, b])

        if self._use_buffered:
            try:
                mlp_out_pad = self._mlp_call(Bp, tile_b, True)(*args)
            except Exception:
                mlp_out_pad = self._mlp_call(Bp, tile_b, False)(*args)
        else:
            mlp_out_pad = self._mlp_call(Bp, tile_b, False)(*args)

        # Exact torch semantics: reshape(2, B, T, L) of the (B, 2*T*L) output
        # (interleaves rows across the leading axis — kept as plain-JAX glue).
        mlp_out = mlp_out_pad[:B, :out_dim]
        out_mat = mlp_out.reshape(2, B, T, L)
        means = out_mat[0]                    # (B, T, L)
        sds_raw = out_mat[1]                  # log-sds, (B, T, L)

        # Batched, lane-dense diag-embed of the variances.
        tile_d = self._choose_tile_diag(B)
        Bp2 = _round_up(max(B, 1), tile_d)
        s2 = jnp.pad(sds_raw.reshape(B, T * L), ((0, Bp2 - B), (0, 0)))

        if self._use_buffered:
            try:
                corr_flat = self._diag_call(Bp2, tile_d, True)(s2, self._diag_mask)
            except Exception:
                corr_flat = self._diag_call(Bp2, tile_d, False)(s2, self._diag_mask)
        else:
            corr_flat = self._diag_call(Bp2, tile_d, False)(s2, self._diag_mask)

        corr_sds = corr_flat[:B].reshape(B, T, T, L)
        return means, corr_sds


# --------------------------------------------------------------------------
# Pure-JAX reference (mirrors the PyTorch forward; same bf16 dot boundary)
# --------------------------------------------------------------------------
def reference_forward(enc, X):
    batch = X.shape[0]
    h = X.reshape(batch, -1).astype(jnp.float32)
    for (w, b), act in zip(enc.params, enc.activations):
        h = jnp.dot(h.astype(enc.matmul_dtype), w.astype(enc.matmul_dtype),
                    preferred_element_type=jnp.float32) + b
        if act == "relu":
            h = jnp.maximum(h, 0.0)
        elif act == "tanh":
            h = jnp.tanh(h)
    out_mat = h.reshape(2, batch, enc.timesteps, enc.latent_dims)
    means = out_mat[0]
    sds = jnp.exp(out_mat[1])                                   # (B, T, L)
    var = sds ** 2 + enc.slack
    eye = jnp.eye(enc.timesteps, dtype=jnp.float32)
    corr_sds = var[:, :, None, :] * eye[None, :, :, None]       # (B, T, T, L)
    return means, corr_sds


# --------------------------------------------------------------------------
if __name__ == "__main__":
    key = jax.random.PRNGKey(0)
    kp, kx = jax.random.split(key)

    batch, timesteps, observed_dims, latent_dims = 2, 8, 4, 4
    layers_list = [(32, "relu"), (32, "tanh")]

    enc = FeedforwardVAEEncoderPallas(layers_list, latent_dims, observed_dims,
                                      timesteps, kp)
    X = jax.random.normal(kx, (batch, timesteps, observed_dims), jnp.float32)

    means, corr_sds = enc(X)
    jax.block_until_ready((means, corr_sds))

    m_ref, c_ref = reference_forward(enc, X)
    assert means.shape == (batch, timesteps, latent_dims)
    assert corr_sds.shape == (batch, timesteps, timesteps, latent_dims)
    assert jnp.allclose(means, m_ref, atol=1e-4, rtol=1e-4)
    assert jnp.allclose(corr_sds, c_ref, atol=1e-4, rtol=1e-4)

    print("KERNEL_OK")
</pallas_src>

<mosaic_0001>
module attributes {stable_mosaic.version = 11 : i64} {
  func.func @_k(%arg0: i32, %arg1: memref<1x128xf32, #tpu.memory_space<vmem>>, %arg2: memref<8x128xf32, #tpu.memory_space<vmem>>, %arg3: memref<8x128xf32, #tpu.memory_space<vmem>>) attributes {dimension_semantics = [#tpu.dimension_semantics<arbitrary>], iteration_bounds = array<i64: 2>, scalar_prefetch = 0 : i64, scratch_operands = 0 : i64, tpu.core_type = #tpu.core_type<tc>, window_params = [{pipeline_mode = #tpu.pipeline_mode<synchronous>, transform_indices = @transform_0, window_bounds = array<i64: 1, 128>}, {transform_indices = @transform_1, window_bounds = array<i64: 8, 128>}, {transform_indices = @transform_2, window_bounds = array<i64: 8, 128>}]} {
    %c0 = arith.constant 0 : index
    %c0_0 = arith.constant 0 : index
    %0 = vector.load %arg2[%c0, %c0_0] : memref<8x128xf32, #tpu.memory_space<vmem>>, vector<8x128xf32>
    %c0_1 = arith.constant 0 : index
    %c0_2 = arith.constant 0 : index
    %1 = vector.load %arg1[%c0_1, %c0_2] : memref<1x128xf32, #tpu.memory_space<vmem>>, vector<1x128xf32>
    %2 = vector.broadcast %1 : vector<1x128xf32> to vector<8x128xf32>
    %3 = arith.addf %0, %2 : vector<8x128xf32>
    %c0_3 = arith.constant 0 : index
    %c0_4 = arith.constant 0 : index
    %4 = vector.load %arg3[%c0_3, %c0_4] : memref<8x128xf32, #tpu.memory_space<vmem>>, vector<8x128xf32>
    tpu.vector_store %arg3[%c0_3, %c0_4], %3 {strides = array<i32>} : memref<8x128xf32, #tpu.memory_space<vmem>>, vector<8x128xf32>,
    return
  }
  func.func @transform_0(%arg0: i32) -> (i32, i32) {
    %c0_i32 = arith.constant 0 : i32
    %c0_i32_0 = arith.constant 0 : i32
    %c0_i32_1 = arith.constant 0 : i32
    return %c0_i32, %c0_i32_0 : i32, i32
  }
  func.func @transform_1(%arg0: i32) -> (i32, i32) {
    %c0_i32 = arith.constant 0 : i32
    %c0_i32_0 = arith.constant 0 : i32
    return %arg0, %c0_i32 : i32, i32
  }
  func.func @transform_2(%arg0: i32) -> (i32, i32) {
    %c0_i32 = arith.constant 0 : i32
    %c0_i32_0 = arith.constant 0 : i32
    return %arg0, %c0_i32 : i32, i32
  }
}

module attributes {stable_mosaic.version = 11 : i64} {
  func.func @_mlp_kernel(%arg0: i32, %arg1: memref<8x128xbf16, #tpu.memory_space<vmem>>, %arg2: memref<128x128xbf16, #tpu.memory_space<vmem>>, %arg3: memref<1x128xf32, #tpu.memory_space<vmem>>, %arg4: memref<128x128xbf16, #tpu.memory_space<vmem>>, %arg5: memref<1x128xf32, #tpu.memory_space<vmem>>, %arg6: memref<128x128xbf16, #tpu.memory_space<vmem>>, %arg7: memref<1x128xf32, #tpu.memory_space<vmem>>, %arg8: memref<8x128xf32, #tpu.memory_space<vmem>>) attributes {dimension_semantics = [#tpu.dimension_semantics<parallel>], iteration_bounds = array<i64: 1>, scalar_prefetch = 0 : i64, scratch_operands = 0 : i64, tpu.core_type = #tpu.core_type<tc>, window_params = [{transform_indices = @transform_0, window_bounds = array<i64: 8, 128>}, {pipeline_mode = #tpu.pipeline_mode<synchronous>, transform_indices = @transform_1, window_bounds = array<i64: 128, 128>}, {pipeline_mode = #tpu.pipeline_mode<synchronous>, transform_indices = @transform_2, window_bounds = array<i64: 1, 128>}, {pipeline_mode = #tpu.pipeline_mode<synchronous>, transform_indices = @transform_3, window_bounds = array<i64: 128, 128>}, {pipeline_mode = #tpu.pipeline_mode<synchronous>, transform_indices = @transform_4, window_bounds = array<i64: 1, 128>}, {pipeline_mode = #tpu.pipeline_mode<synchronous>, transform_indices = @transform_5, window_bounds = array<i64: 128, 128>}, {pipeline_mode = #tpu.pipeline_mode<synchronous>, transform_indices = @transform_6, window_bounds = array<i64: 1, 128>}, {transform_indices = @transform_7, window_bounds = array<i64: 8, 128>}]} {
    %c0 = arith.constant 0 : index
    %c0_0 = arith.constant 0 : index
    %0 = vector.load %arg1[%c0, %c0_0] : memref<8x128xbf16, #tpu.memory_space<vmem>>, vector<8x128xbf16>
    %c0_1 = arith.constant 0 : index
    %c0_2 = arith.constant 0 : index
    %1 = vector.load %arg2[%c0_1, %c0_2] : memref<128x128xbf16, #tpu.memory_space<vmem>>, vector<128x128xbf16>
    %c0_3 = arith.constant 0 : index
    %c0_4 = arith.constant 0 : index
    %2 = vector.load %arg3[%c0_3, %c0_4] : memref<1x128xf32, #tpu.memory_space<vmem>>, vector<1x128xf32>
    %cst = arith.constant dense<0.000000e+00> : vector<8x128xf32>
    %3 = tpu.matmul %0, %1, %cst {dimension_numbers = #tpu.dot_dimension_numbers<[1], [0], [0], [1], [0, 0, 1, 1], [], []>} : vector<8x128xbf16>, vector<128x128xbf16>, vector<8x128xf32> -> vector<8x128xf32>
    %4 = vector.broadcast %2 : vector<1x128xf32> to vector<8x128xf32>
    %5 = arith.addf %3, %4 : vector<8x128xf32>
    %cst_5 = arith.constant 0.000000e+00 : f32
    %6 = vector.broadcast %cst_5 : f32 to vector<8x128xf32>
    %7 = arith.maximumf %5, %6 : vector<8x128xf32>
    %c0_6 = arith.constant 0 : index
    %c0_7 = arith.constant 0 : index
    %8 = vector.load %arg4[%c0_6, %c0_7] : memref<128x128xbf16, #tpu.memory_space<vmem>>, vector<128x128xbf16>
    %c0_8 = arith.constant 0 : index
    %c0_9 = arith.constant 0 : index
    %9 = vector.load %arg5[%c0_8, %c0_9] : memref<1x128xf32, #tpu.memory_space<vmem>>, vector<1x128xf32>
    %10 = arith.truncf %7 : vector<8x128xf32> to vector<8x128xbf16>
    %cst_10 = arith.constant dense<0.000000e+00> : vector<8x128xf32>
    %11 = tpu.matmul %10, %8, %cst_10 {dimension_numbers = #tpu.dot_dimension_numbers<[1], [0], [0], [1], [0, 0, 1, 1], [], []>} : vector<8x128xbf16>, vector<128x128xbf16>, vector<8x128xf32> -> vector<8x128xf32>
    %12 = vector.broadcast %9 : vector<1x128xf32> to vector<8x128xf32>
    %13 = arith.addf %11, %12 : vector<8x128xf32>
    %14 = math.tanh %13 : vector<8x128xf32>
    %c0_11 = arith.constant 0 : index
    %c0_12 = arith.constant 0 : index
    %15 = vector.load %arg6[%c0_11, %c0_12] : memref<128x128xbf16, #tpu.memory_space<vmem>>, vector<128x128xbf16>
    %c0_13 = arith.constant 0 : index
    %c0_14 = arith.constant 0 : index
    %16 = vector.load %arg7[%c0_13, %c0_14] : memref<1x128xf32, #tpu.memory_space<vmem>>, vector<1x128xf32>
    %17 = arith.truncf %14 : vector<8x128xf32> to vector<8x128xbf16>
    %cst_15 = arith.constant dense<0.000000e+00> : vector<8x128xf32>
    %18 = tpu.matmul %17, %15, %cst_15 {dimension_numbers = #tpu.dot_dimension_numbers<[1], [0], [0], [1], [0, 0, 1, 1], [], []>} : vector<8x128xbf16>, vector<128x128xbf16>, vector<8x128xf32> -> vector<8x128xf32>
    %19 = vector.broadcast %16 : vector<1x128xf32> to vector<8x128xf32>
    %20 = arith.addf %18, %19 : vector<8x128xf32>
    %c0_16 = arith.constant 0 : index
    %c0_17 = arith.constant 0 : index
    %21 = vector.load %arg8[%c0_16, %c0_17] : memref<8x128xf32, #tpu.memory_space<vmem>>, vector<8x128xf32>
    tpu.vector_store %arg8[%c0_16, %c0_17], %20 {strides = array<i32>} : memref<8x128xf32, #tpu.memory_space<vmem>>, vector<8x128xf32>,
    return
  }
  func.func @transform_0(%arg0: i32) -> (i32, i32) {
    %c0_i32 = arith.constant 0 : i32
    %c0_i32_0 = arith.constant 0 : i32
    return %arg0, %c0_i32 : i32, i32
  }
  func.func @transform_1(%arg0: i32) -> (i32, i32) {
    %c0_i32 = arith.constant 0 : i32
    %c0_i32_0 = arith.constant 0 : i32
    %c0_i32_1 = arith.constant 0 : i32
    return %c0_i32, %c0_i32_0 : i32, i32
  }
  func.func @transform_2(%arg0: i32) -> (i32, i32) {
    %c0_i32 = arith.constant 0 : i32
    %c0_i32_0 = arith.constant 0 : i32
    %c0_i32_1 = arith.constant 0 : i32
    return %c0_i32, %c0_i32_0 : i32, i32
  }
  func.func @transform_3(%arg0: i32) -> (i32, i32) {
    %c0_i32 = arith.constant 0 : i32
    %c0_i32_0 = arith.constant 0 : i32
    %c0_i32_1 = arith.constant 0 : i32
    return %c0_i32, %c0_i32_0 : i32, i32
  }
  func.func @transform_4(%arg0: i32) -> (i32, i32) {
    %c0_i32 = arith.constant 0 : i32
    %c0_i32_0 = arith.constant 0 : i32
    %c0_i32_1 = arith.constant 0 : i32
    return %c0_i32, %c0_i32_0 : i32, i32
  }
  func.func @transform_5(%arg0: i32) -> (i32, i32) {
    %c0_i32 = arith.constant 0 : i32
    %c0_i32_0 = arith.constant 0 : i32
    %c0_i32_1 = arith.constant 0 : i32
    return %c0_i32, %c0_i32_0 : i32, i32
  }
  func.func @transform_6(%arg0: i32) -> (i32, i32) {
    %c0_i32 = arith.constant 0 : i32
    %c0_i32_0 = arith.constant 0 : i32
    %c0_i32_1 = arith.constant 0 : i32
    return %c0_i32, %c0_i32_0 : i32, i32
  }
  func.func @transform_7(%arg0: i32) -> (i32, i32) {
    %c0_i32 = arith.constant 0 : i32
    %c0_i32_0 = arith.constant 0 : i32
    return %arg0, %c0_i32 : i32, i32
  }
}

</mosaic_0001>

<bundles_post_ra>
// kernel: tpu_custom_call.1
= control target key start
LH: loop header
LB: loop body
LE: loop exit
PB: predicated region body
PF: predicated region fallthrough
CT: control target
= control target key end

     0   :  { %7 = vsyncpa [#allocation3], 0  ;;  %s699_s0 = inlined_call_operand.hbm [shape: f32[1,128], index: 0, kind: input, shape index: {}]   ;;  %s700_s1 = inlined_call_operand.hbm [shape: f32[16,128], index: 1, kind: input, shape index: {}]   ;;  %s701_s2 = inlined_call_operand.hbm [shape: f32[16,128], index: 2, kind: output, shape index: {}]  }
   0x1   :  { %8 = vsyncpa [#allocation6], 0 }
   0x2   :  { %10 = vsyncpa [#allocation6 + $0x1], 0 }
   0x3   :  { %11 = vsyncpa [#allocation4], 0 }
   0x4   :  { %13 = vsyncpa [#allocation4 + $0x1], 0  ;;  %s498_s9 = smov 0   ;;  %s500_s10 = smov 0  }
   0x5   :  { %s502_s11 = smov 0   ;;  %s504_s12 = smov 0  }
   0x6 LB: > { %s519_s13 = sadd.s32 4294967295, %s478_s12   ;;  %s278_s14 = sadd.s32 4294967294, %s478_s12   ;;  %s478_s12 = sphi %s504_s12, %s725_s12   ;;  %s474_s11 = sphi %s502_s11, %s724_s11   ;;  %s470_s10 = sphi %s500_s10, %s723_s10   ;;  %s466_s9 = sphi %s498_s9, %s722_s9  }
   0x7   : > { %p60_p0 = scmp.ne.s32.totalorder %s470_s10, %s466_s9  ;;  %p702_p1 = scmp.eq.s32.totalorder %s519_s13, 0 }
   0x8   : > { %p90_p3 = scmp.eq.s32.totalorder %s278_s14, 1  ;;  %p279_p5 = scmp.ge.s32.totalorder %s478_s12, 1 }
   0x9   : > { %p528_p4 = por %p702_p1, %p60_p0  ;;  %p97_p7 = scmp.lt.s32.totalorder %s478_s12, 3 }
   0xa   : > { %p533_p6 = por %p90_p3, %p60_p0  ;;  %s480_s18 = smov [#allocation2]  }
   0xb   : > { %s705_s15 = scalar_select %p528_p4, 1, 0 }
   0xc   : > { %s706_s16 = scalar_select %p533_p6, 1, 0 }
   0xd   : > { %p538_p8 = pnand %p279_p5, %p97_p7  ;;  %s110_s19 = sshll.u32 %s480_s18, 4  ;;  %s111_s19 = int_to_ptr.vmem [resolvable:$true] %s110_s19 }
   0xe   : > { %s546_s20 = sadd.s32 1, %s478_s12   ;;  %s47_s24 = sadd.s32 1, %s474_s11 }
   0xf   : > { %s707_s17 = scalar_select %p538_p8, 1, 0 }
  0x10   : > { %p301_p10 = pneg %p538_p8  ;;  %s44_s22 = ssub.s32 %s478_s12, %s546_s20 }
  0x11   : > { %p556_p12 = scmp.eq.s32.totalorder %s44_s22, 0  ;;  %s350_s27 = scalar_lea.hbm %s699_s0, 16 }
  0x12   : > { %p550_p11 = pnand %p301_p10, %p702_p1  ;;  %p351_p0 = scmp.ne.s32.totalorder %s699_s0, %s350_s27 }
  0x13   : > { %s709_s23 = scalar_select %p556_p12, 1, 0 }
  0x14   : > { %p352_p3 = pneg %p550_p11  ;;  %p357_p10 = scmp.lt.u32.totalorder %s350_s27, %s699_s0 }
  0x16   : > { %p353_p5 = pnand %p352_p3, %p351_p0 }
  0x18   : > { %p354_p7 = pneg %p353_p5 }
  0x1a   : > { %p359_p9 = pnand %p357_p10, %p354_p7 }
  0x1c   : > { %362 = shalt.err (!%p359_p9)
}
  0x1d   : > { %s363_s4 = scalar_lea.vmem %s111_s19, 16  ;;  %s370_s5 = scalar_lea.vmem %s111_s19, 32 }
  0x1e   : > { %p364_p1 = scmp.ne.s32.totalorder %s111_s19, %s363_s4  ;;  %p371_p6 = scmp.lt.s32.totalorder %s111_s19, %s111_s19 }
  0x1f   : > { %p372_p4 = scmp.lt.s32.totalorder %s370_s5, %s363_s4 }
  0x20   : > { %p366_p2 = pnand %p364_p1, %p352_p3 }
  0x21   : > { %p373_p8 = por %p372_p4, %p371_p6 }
  0x22   : > { %p367_p13 = pneg %p366_p2 }
  0x24   : > { %p374_p12 = pnand %p373_p8, %p367_p13 }
  0x26   : > { %377 = shalt.err (!%p374_p12)
}
  0x27   : > { %304 = dma.hbm_to_vmem [thread:$0]  (!%p550_p11), %s699_s0, 16, %s111_s19, [#allocation3]  }
  0x28   : > { %p710_p1 = scmp.ne.s32.totalorder %s709_s23, 0  ;;  %p55_p2 = scmp.eq.s32.totalorder %s478_s12, 0 }
  0x29   : > { %p711_p4 = scmp.ne.s32.totalorder %s474_s11, %s470_s10  ;;  %p712_p6 = scmp.eq.s32.totalorder %s519_s13, 1 }
  0x2a   : > { %s582_s8 = scalar_select %p710_p1, %s474_s11, %s47_s24  }
  0x2b   : > { %p590_p8 = por %p712_p6, %p711_p4  ;;  %p314_p9 = scmp.lt.s32.totalorder %s478_s12, 2 }
  0x2c   : > { %s121_s18 = sand.u32 1, %s474_s11   ;;  %p714_p12 = pmov %p711_p4 }
  0x2d   : > { %s282_s21 = sshll.u32 %s121_s18, 3  ;;  %s283_s22 = sshll.u32 %s478_s12, 7 }
  0x2e   : > { %p56_p13 = por %p55_p2, %p714_p12  ;;  %s603_s19 = scalar_lea.hbm %s700_s1, %s283_s22 }
  0x2f   : > { %s125_s23 = scalar_lea.vmem [#allocation5], %s282_s21  ;;  %s122_s28 = scalar_lea.sflag [#allocation6], %s121_s18 }
  0x30   : > { %s132_s24 = sshll.u32 %s125_s23, 4  ;;  %p605_p11 = pnand %p314_p9, %p56_p13  ;;  %s609_s24 = int_to_ptr.vmem [resolvable:$true] %s132_s24 }
  0x31   : > { %s378_s29 = scalar_lea.hbm %s603_s19, 128  ;;  %s383_s4 = scalar_lea.hbm %s700_s1, 256 }
  0x32   : > { %p379_p0 = scmp.ne.s32.totalorder %s603_s19, %s378_s29  ;;  %p380_p3 = pneg %p605_p11 }
  0x33   : > { %p384_p10 = scmp.lt.u32.totalorder %s603_s19, %s700_s1  ;;  %p385_p1 = scmp.lt.u32.totalorder %s383_s4, %s378_s29 }
  0x34   : > { %p381_p5 = pnand %p380_p3, %p379_p0  ;;  %p387_p4 = scmp.lt.u32.totalorder %s378_s29, %s603_s19 }
  0x35   : > { %p386_p2 = por %p385_p1, %p384_p10 }
  0x36   : > { %p382_p7 = pneg %p381_p5 }
  0x37   : > { %p388_p6 = por %p387_p4, %p386_p2 }
  0x39   : > { %p389_p9 = pnand %p388_p6, %p382_p7 }
  0x3b   : > { %392 = shalt.err (!%p389_p9)
}
  0x3c   : > { %s393_s7 = scalar_lea.vmem %s609_s24, 128  ;;  %s481_s18 = smov [#allocation5]  }
  0x3d   : > { %p394_p12 = scmp.ne.s32.totalorder %s609_s24, %s393_s7  ;;  %s398_s21 = sshll.u32 %s481_s18, 4  ;;  %s399_s21 = int_to_ptr.vmem [resolvable:$false] %s398_s21 }
  0x3e   : > { %s400_s22 = scalar_lea.vmem %s399_s21, 256  ;;  %p401_p5 = scmp.lt.s32.totalorder %s609_s24, %s399_s21 }
  0x3f   : > { %p396_p13 = pnand %p394_p12, %p380_p3  ;;  %p402_p10 = scmp.lt.s32.totalorder %s400_s22, %s393_s7 }
  0x41   : > { %p397_p0 = pneg %p396_p13  ;;  %p403_p1 = por %p402_p10, %p401_p5 }
  0x43   : > { %p404_p2 = pnand %p403_p1, %p397_p0 }
  0x45   : > { %407 = shalt.err (!%p404_p2)
}
  0x46   : > { %308 = dma.hbm_to_vmem [thread:$0]  (!%p605_p11), %s603_s19, 128, %s609_s24, %s122_s28  }
  0x47   : > { %p716_p7 = scmp.ne.s32.totalorder %s707_s17, 0 }
  0x48   : > { %p717_p3 = scmp.eq.s32.totalorder (!%p716_p7), %s519_s13, 0 }
  0x49   : > { %141 = sbr.rel (%p716_p7) target bundleno = 110 (0x6e), region = 28 }
  0x50   : > { %453 = dma.done.wait (%p717_p3), [#allocation3], 16   ;;  %p718_p4 = pmov %p717_p3 }
  0x51   : > { %s643_s25 = sand.u32 1, %s470_s10   ;;  %p719_p6 = scmp.ne.s32.totalorder %s705_s15, 0 }
  0x52   : > { %455 = vsyncadd (%p718_p4), [#allocation3], 4294967280  ;;  %s286_s26 = sshll.u32 %s643_s25, 3  ;;  %s148_s23 = scalar_lea.sflag [#allocation6], %s643_s25 }
  0x53   : > { %s151_s27 = scalar_lea.vmem [#allocation5], %s286_s26 }
  0x54   : > { %457 = dma.done.wait (%p719_p6), %s148_s23, 128  }
  0x55   : > { %459 = vsyncadd (%p719_p6), %s148_s23, 4294967168  ;;  %s171_s17 = scalar_lea.vmem [#allocation7], %s286_s26  ;;  %s290_s24 = sshll.u32 %s519_s13, 7  ;;  %v172_v0 = vld [vmem:[%s151_s27] sm:$0xff]  ;;  %v288_v1 = vld [vmem:[#allocation2] ss:$0 sm:$0xff] }
  0x56   : > { %s196_s19 = sshll.u32 %s171_s17, 4  ;;  %v180_v2 = vadd.f32 %v288_v1, %v172_v0  ;;  %s657_s30 = scalar_lea.hbm %s701_s2, %s290_s24  ;;  %s652_s19 = int_to_ptr.vmem [resolvable:$true] %s196_s19 }
  0x57   : > { %s183_s15 = scalar_lea.sflag [#allocation4], %s643_s25  ;;  %s408_s3 = scalar_lea.vmem %s652_s19, 128 }
  0x58   : > { %181 = vst [vmem:[%s171_s17] sm:$0xff] %v180_v2  ;;  %p409_p11 = scmp.ne.s32.totalorder %s652_s19, %s408_s3  ;;  %s482_s13 = smov [#allocation7]  }
  0x59   : > { %s412_s4 = sshll.u32 %s482_s13, 4  ;;  %s413_s4 = int_to_ptr.vmem [resolvable:$false] %s412_s4 }
  0x5a   : > { %p410_p9 = pnand %p409_p11, %p590_p8  ;;  %s414_s5 = scalar_lea.vmem %s413_s4, 256 }
  0x5b   : > { %p415_p13 = scmp.lt.s32.totalorder %s652_s19, %s413_s4  ;;  %p416_p0 = scmp.lt.s32.totalorder %s414_s5, %s408_s3 }
  0x5c   : > { %p411_p12 = pneg %p410_p9 }
  0x5d   : > { %p417_p5 = por %p416_p0, %p415_p13 }
  0x5f   : > { %p418_p10 = pnand %p417_p5, %p411_p12 }
  0x61   : > { %421 = shalt.err (!%p418_p10)
}
  0x62   : > { %s422_s6 = scalar_lea.hbm %s657_s30, 128  ;;  %s426_s21 = scalar_lea.hbm %s701_s2, 256 }
  0x63   : > { %p423_p1 = scmp.ne.s32.totalorder %s657_s30, %s422_s6  ;;  %p427_p3 = scmp.lt.u32.totalorder %s657_s30, %s701_s2 }
  0x64   : > { %p428_p4 = scmp.lt.u32.totalorder %s426_s21, %s422_s6  ;;  %p430_p11 = scmp.lt.u32.totalorder %s422_s6, %s657_s30 }
  0x65   : > { %p424_p2 = pnand %p423_p1, %p590_p8 }
  0x66   : > { %p429_p6 = por %p428_p4, %p427_p3 }
  0x67   : > { %p425_p7 = pneg %p424_p2 }
  0x68   : > { %p431_p9 = por %p430_p11, %p429_p6 }
  0x6a   : > { %p432_p12 = pnand %p431_p9, %p425_p7 }
  0x6c   : > { %435 = shalt.err (!%p432_p12)
}
  0x6d   : > { %299 = dma.vmem_to_hbm [thread:$0]  (%p590_p8), %s652_s19, 128, %s657_s30, %s183_s15  }
  0x6e PF: > { %s208_s26 = sand.u32 1, %s466_s9   ;;  %p720_p13 = scmp.ne.s32.totalorder %s706_s16, 0 }
  0x6f   : > { %p721_p0 = scmp.ge.s32.totalorder %s478_s12, 2  ;;  %s209_s23 = scalar_lea.sflag [#allocation4], %s208_s26 }
  0x71   : > { %p310_p5 = pnand %p721_p0, %p720_p13 }
  0x73   : > { %461 = dma.done.wait (!%p310_p5), %s209_s23, 128  }
  0x74   : > { %463 = vsyncadd (!%p310_p5), %s209_s23, 4294967168  ;;  %p16_p10 = scmp.ge.s32.totalorder %s546_s20, 4   ;;  %s722_s9 = smov %s470_s10 }
  0x75   : > { %s723_s10 = smov %s474_s11  ;;  %s724_s11 = smov %s582_s8 }
  0x76   : > { %s725_s12 = smov %s546_s20  ;;  %18 = sbr.rel (!%p16_p10) target bundleno = 6 (0x6), region = 78 }
  0x7d   :  { %214 = vsyncpa [#allocation3], 1 }
  0x7e   :  { %216 = vsyncpa [#allocation3 + $0x1], 1 }
  0x7f   :  { %217 = vsyncpa [#allocation6], 1 }
  0x80   :  { %219 = vsyncpa [#allocation6 + $0x1], 1 }
  0x81   :  { %220 = vsyncpa [#allocation4], 1 }
  0x82   :  { %222 = vsyncpa [#allocation4 + $0x1], 1 }

// kernel: tpu_custom_call.1
= control target key start
LH: loop header
LB: loop body
LE: loop exit
PB: predicated region body
PF: predicated region fallthrough
CT: control target
= control target key end

     0   :  { %12 = vsyncpa [#allocation3], 0  ;;  %s861_s0 = inlined_call_operand.hbm [shape: bf16[8,128], index: 0, kind: input, shape index: {}]   ;;  %s862_s1 = inlined_call_operand.hbm [shape: bf16[128,128], index: 1, kind: input, shape index: {}]   ;;  %s863_s2 = inlined_call_operand.vmem [shape: f32[1,128], index: 2, kind: input, shape index: {}]   ;;  %s864_s3 = inlined_call_operand.hbm [shape: bf16[128,128], index: 3, kind: input, shape index: {}]   ;;  %s865_s4 = inlined_call_operand.vmem [shape: f32[1,128], index: 4, kind: input, shape index: {}]   ;;  %s866_s5 = inlined_call_operand.hbm [shape: bf16[128,128], index: 5, kind: input, shape index: {}]   ;;  %s867_s6 = inlined_call_operand.vmem [shape: f32[1,128], index: 6, kind: input, shape index: {}]   ;;  %s868_s7 = inlined_call_operand.hbm [shape: f32[8,128], index: 7, kind: output, shape index: {}]  }
   0x1   :  { %13 = vsyncpa [#allocation6], 0 }
   0x2   :  { %14 = vsyncpa [#allocation9], 0 }
   0x3   :  { %15 = vsyncpa [#allocation4], 0  ;;  %s704_s24 = smov [#allocation5]   ;;  %s586_s28 = scalar_lea.hbm %s862_s1, 1024 }
   0x4   :  { %s31_s25 = sshll.u32 %s704_s24, 4  ;;  %p587_p0 = scmp.ne.s32.totalorder %s862_s1, %s586_s28  ;;  %s32_s25 = int_to_ptr.vmem [resolvable:$true] %s31_s25 }
   0x5   :  { %p590_p1 = scmp.lt.u32.totalorder %s586_s28, %s862_s1 }
   0x7   :  { %p592_p2 = pnand %p590_p1, %p587_p0 }
   0x9   :  { %595 = shalt.err (!%p592_p2)
}
   0xa   :  { %s596_s10 = scalar_lea.vmem %s32_s25, 1024  ;;  %p601_p4 = scmp.lt.s32.totalorder %s32_s25, %s32_s25 }
   0xb   :  { %p597_p3 = scmp.ne.s32.totalorder %s32_s25, %s596_s10  ;;  %p602_p5 = scmp.lt.s32.totalorder %s596_s10, %s596_s10 }
   0xd   :  { %p603_p6 = por %p602_p5, %p601_p4 }
   0xf   :  { %p604_p7 = pnand %p603_p6, %p597_p3 }
  0x11   :  { %607 = shalt.err (!%p604_p7)
}
  0x12   :  { %s705_s11 = smov 64   ;;  %s706_s12 = smov 4  }
  0x13   :  { %37 = dma.hbm_to_vmem [thread:$0]  %s862_s1, 1024, %s32_s25, [#allocation6], %s705_s11, %s705_s11, %s706_s12  }
  0x14   :  { %s707_s15 = smov [#allocation2]   ;;  %s708_s17 = smov [#allocation7]  }
  0x15   :  { %s22_s16 = sshll.u32 %s707_s15, 4  ;;  %s45_s18 = sshll.u32 %s708_s17, 4  ;;  %s23_s16 = int_to_ptr.vmem [resolvable:$true] %s22_s16  ;;  %s46_s18 = int_to_ptr.vmem [resolvable:$true] %s45_s18 }
  0x16   :  { %s608_s21 = scalar_lea.hbm %s861_s0, 64 }
  0x17   :  { %p609_p8 = scmp.ne.s32.totalorder %s861_s0, %s608_s21  ;;  %p612_p9 = scmp.lt.u32.totalorder %s608_s21, %s861_s0 }
  0x19   :  { %p614_p10 = pnand %p612_p9, %p609_p8 }
  0x1b   :  { %617 = shalt.err (!%p614_p10)
}
  0x1c   :  { %s618_s1 = scalar_lea.vmem %s23_s16, 64  ;;  %p623_p12 = scmp.lt.s32.totalorder %s23_s16, %s23_s16 }
  0x1d   :  { %p619_p11 = scmp.ne.s32.totalorder %s23_s16, %s618_s1  ;;  %p624_p13 = scmp.lt.s32.totalorder %s618_s1, %s618_s1 }
  0x1f   :  { %p625_p0 = por %p624_p13, %p623_p12 }
  0x21   :  { %p626_p1 = pnand %p625_p0, %p619_p11 }
  0x23   :  { %629 = shalt.err (!%p626_p1)
}
  0x24   :  { %25 = dma.hbm_to_vmem [thread:$0]  %s861_s0, 64, %s23_s16, [#allocation3]  }
  0x25   :  { %s630_s30 = scalar_lea.hbm %s864_s3, 1024 }
  0x26   :  { %p631_p2 = scmp.ne.s32.totalorder %s864_s3, %s630_s30  ;;  %p634_p3 = scmp.lt.u32.totalorder %s630_s30, %s864_s3 }
  0x28   :  { %p636_p4 = pnand %p634_p3, %p631_p2 }
  0x2a   :  { %639 = shalt.err (!%p636_p4)
}
  0x2b   :  { %s640_s14 = scalar_lea.vmem %s46_s18, 1024  ;;  %p645_p6 = scmp.lt.s32.totalorder %s46_s18, %s46_s18 }
  0x2c   :  { %p641_p5 = scmp.ne.s32.totalorder %s46_s18, %s640_s14  ;;  %p646_p7 = scmp.lt.s32.totalorder %s640_s14, %s640_s14 }
  0x2e   :  { %p647_p8 = por %p646_p7, %p645_p6 }
  0x30   :  { %p648_p9 = pnand %p647_p8, %p641_p5 }
  0x32   :  { %651 = shalt.err (!%p648_p9)
}
  0x33   :  { %51 = dma.hbm_to_vmem [thread:$0]  %s864_s3, 1024, %s46_s18, [#allocation6], %s705_s11, %s705_s11, %s706_s12  }
  0x34   :  { %s709_s16 = smov [#allocation8]   ;;  %s652_s21 = scalar_lea.hbm %s866_s5, 1024 }
  0x35   :  { %s59_s17 = sshll.u32 %s709_s16, 4  ;;  %p653_p10 = scmp.ne.s32.totalorder %s866_s5, %s652_s21  ;;  %s60_s17 = int_to_ptr.vmem [resolvable:$true] %s59_s17 }
  0x36   :  { %p656_p11 = scmp.lt.u32.totalorder %s652_s21, %s866_s5 }
  0x38   :  { %p658_p12 = pnand %p656_p11, %p653_p10 }
  0x3a   :  { %661 = shalt.err (!%p658_p12)
}
  0x3b   :  { %s662_s1 = scalar_lea.vmem %s60_s17, 1024  ;;  %p667_p0 = scmp.lt.s32.totalorder %s60_s17, %s60_s17 }
  0x3c   :  { %p663_p13 = scmp.ne.s32.totalorder %s60_s17, %s662_s1  ;;  %p668_p1 = scmp.lt.s32.totalorder %s662_s1, %s662_s1 }
  0x3e   :  { %p669_p2 = por %p668_p1, %p667_p0 }
  0x40   :  { %p670_p3 = pnand %p669_p2, %p663_p13 }
  0x42   :  { %673 = shalt.err (!%p670_p3)
}
  0x43   :  { %65 = dma.hbm_to_vmem [thread:$0]  %s866_s5, 1024, %s60_s17, [#allocation9], %s705_s11, %s705_s11, %s706_s12  }
  0x44   :  { %696 = dma.done.wait [#allocation3], 64  }
  0x45   :  { %697 = vsyncadd [#allocation3], 4294967232 }
  0x46   :  { %698 = dma.done.wait [#allocation6], 2048  }
  0x47   :  { %699 = vsyncadd [#allocation6], 4294965248 }
  0x48   :  { %700 = dma.done.wait [#allocation9], 1024  }
  0x49   :  { %701 = vsyncadd [#allocation9], 4294966272  ;;  %v710_v0 = vmov 0.0   ;;  %vm711_vm0 = vmmov 0   ;;  %v560_v1 = vld [vmem:[#allocation5] sm:$0xff]   ;;  %v561_v2 = vld [vmem:[#allocation5 + $0x8] sm:$0xff]  }
  0x4a   :  { %491 = vmatprep.subr.bf16.mxu0 %v710_v0  ;;  %507 = vmatprep.mubr.msk.bf16.mxu0 %vm711_vm0, %v710_v0  ;;  %v562_v3 = vld [vmem:[#allocation5 + $0x10] sm:$0xff]   ;;  %v568_v4 = vld [vmem:[#allocation7] sm:$0xff]   ;;  %v563_v5 = vld [vmem:[#allocation5 + $0x18] sm:$0xff]   ;;  %s712_s28 = smov [#allocation10]  }
  0x4b   :  { %511 = vmatprep.subr.bf16.mxu1 %v710_v0  ;;  %527 = vmatprep.mubr.msk.bf16.mxu1 %vm711_vm0, %v710_v0  ;;  %v569_v6 = vld [vmem:[#allocation7 + $0x8] sm:$0xff]   ;;  %v564_v7 = vld [vmem:[#allocation5 + $0x20] sm:$0xff]   ;;  %v570_v8 = vld [vmem:[#allocation7 + $0x10] sm:$0xff]   ;;  %s426_s29 = sshll.u32 %s712_s28, 4  ;;  %s427_s29 = int_to_ptr.vmem [resolvable:$true] %s426_s29 }
  0x4c   :  { %492 = vmatpush3.bf16.msra.mxu0 %v560_v1  ;;  %512 = vmatpush3.bf16.msra.mxu1 %v568_v4  ;;  %v565_v9 = vld [vmem:[#allocation5 + $0x28] sm:$0xff]   ;;  %v571_v10 = vld [vmem:[#allocation7 + $0x18] sm:$0xff]   ;;  %v566_v11 = vld [vmem:[#allocation5 + $0x30] sm:$0xff]   ;;  %p679_p5 = scmp.lt.s32.totalorder %s427_s29, %s427_s29 }
  0x4d   :  { %493 = vmatprep.subr.bf16.mxu0 %v710_v0  ;;  %513 = vmatprep.subr.bf16.mxu1 %v710_v0  ;;  %v572_v12 = vld [vmem:[#allocation7 + $0x20] sm:$0xff]   ;;  %v567_v13 = vld [vmem:[#allocation5 + $0x38] sm:$0xff]   ;;  %v573_v14 = vld [vmem:[#allocation7 + $0x28] sm:$0xff]  }
  0x4e   :  { %v81_v15 = vld [vmem:[#allocation2] sm:$0xf]  ;;  %v574_v16 = vld [vmem:[#allocation7 + $0x30] sm:$0xff]   ;;  %v576_v18 = vld [vmem:[#allocation8] sm:$0xff]  }
  0x4f   :  { %v575_v17 = vld [vmem:[#allocation7 + $0x38] sm:$0xff]   ;;  %v577_v19 = vld [vmem:[#allocation8 + $0x8] sm:$0xff]   ;;  %v578_v20 = vld [vmem:[#allocation8 + $0x10] sm:$0xff]  }
  0x50   :  { %494 = vmatpush3.bf16.msra.mxu0 %v561_v2  ;;  %514 = vmatpush3.bf16.msra.mxu1 %v569_v6  ;;  %v579_v21 = vld [vmem:[#allocation8 + $0x18] sm:$0xff]   ;;  %v580_v30 = vld [vmem:[#allocation8 + $0x20] sm:$0xff]   ;;  %v581_v31 = vld [vmem:[#allocation8 + $0x28] sm:$0xff]  }
  0x51   :  { %495 = vmatprep.subr.bf16.mxu0 %v710_v0  ;;  %515 = vmatprep.subr.bf16.mxu1 %v710_v0  ;;  %v437_v22 = vld [vmem:[%s863_s2] ss:$0 sm:$0xff]  ;;  %v582_v32 = vld [vmem:[#allocation8 + $0x30] sm:$0xff]  }
  0x52   :  { %v583_v33 = vld [vmem:[#allocation8 + $0x38] sm:$0xff]  }
  0x53   :  { %v446_v34 = vld [vmem:[%s865_s4] ss:$0 sm:$0xff]  ;;  %s674_s4 = scalar_lea.vmem %s427_s29, 128 }
  0x54   :  { %496 = vmatpush3.bf16.msra.mxu0 %v562_v3  ;;  %516 = vmatpush3.bf16.msra.mxu1 %v570_v8  ;;  %v455_v42 = vld [vmem:[%s867_s6] ss:$0 sm:$0xff]  ;;  %p675_p4 = scmp.ne.s32.totalorder %s427_s29, %s674_s4  ;;  %p680_p6 = scmp.lt.s32.totalorder %s674_s4, %s674_s4 }
  0x55   :  { %497 = vmatprep.subr.bf16.mxu0 %v710_v0  ;;  %517 = vmatprep.subr.bf16.mxu1 %v710_v0 }
  0x56   :  { %p681_p7 = por %p680_p6, %p679_p5 }
  0x58   :  { %498 = vmatpush3.bf16.msra.mxu0 %v563_v5  ;;  %518 = vmatpush3.bf16.msra.mxu1 %v571_v10  ;;  %p682_p8 = pnand %p681_p7, %p675_p4 }
  0x59   :  { %499 = vmatprep.subr.bf16.mxu0 %v710_v0  ;;  %519 = vmatprep.subr.bf16.mxu1 %v710_v0 }
  0x5c   :  { %500 = vmatpush3.bf16.msra.mxu0 %v564_v7  ;;  %520 = vmatpush3.bf16.msra.mxu1 %v572_v12 }
  0x5d   :  { %501 = vmatprep.subr.bf16.mxu0 %v710_v0  ;;  %521 = vmatprep.subr.bf16.mxu1 %v710_v0 }
  0x60   :  { %502 = vmatpush3.bf16.msra.mxu0 %v565_v9  ;;  %522 = vmatpush3.bf16.msra.mxu1 %v573_v14 }
  0x61   :  { %503 = vmatprep.subr.bf16.mxu0 %v710_v0  ;;  %523 = vmatprep.subr.bf16.mxu1 %v710_v0 }
  0x64   :  { %504 = vmatpush3.bf16.msra.mxu0 %v566_v11  ;;  %524 = vmatpush3.bf16.msra.mxu1 %v574_v16 }
  0x65   :  { %505 = vmatprep.subr.bf16.mxu0 %v710_v0  ;;  %525 = vmatprep.subr.bf16.mxu1 %v710_v0 }
  0x68   :  { %506 = vmatpush3.bf16.msra.mxu0 %v567_v13  ;;  %526 = vmatpush3.bf16.msra.mxu1 %v575_v17 }
  0x69   :  { %531 = vmatprep.subr.bf16.mxu0 %v710_v0 }
  0x6b   :  { %508 = vmatmul.mubr.bf16.vlgmr.msra.gmra.mrb[0].mxu0 %v81_v15 }
  0x6c   :  { %547 = vmatprep.mubr.msk.bf16.mxu0 %vm711_vm0, %v710_v0  ;;  %532 = vmatpush3.bf16.msra.mxu0 %v576_v18 }
  0x6d   :  { %533 = vmatprep.subr.bf16.mxu0 %v710_v0 }
  0x70   :  { %534 = vmatpush3.bf16.msra.mxu0 %v577_v19 }
  0x71   :  { %535 = vmatprep.subr.bf16.mxu0 %v710_v0 }
  0x74   :  { %536 = vmatpush3.bf16.msra.mxu0 %v578_v20 }
  0x75   :  { %537 = vmatprep.subr.bf16.mxu0 %v710_v0 }
  0x78   :  { %538 = vmatpush3.bf16.msra.mxu0 %v579_v21 }
  0x79   :  { %539 = vmatprep.subr.bf16.mxu0 %v710_v0 }
  0x7c   :  { %540 = vmatpush3.bf16.msra.mxu0 %v580_v30 }
  0x7d   :  { %541 = vmatprep.subr.bf16.mxu0 %v710_v0 }
  0x80   :  { %542 = vmatpush3.bf16.msra.mxu0 %v581_v31 }
  0x81   :  { %543 = vmatprep.subr.bf16.mxu0 %v710_v0 }
  0x84   :  { %544 = vmatpush3.bf16.msra.mxu0 %v582_v32 }
  0x85   :  { %545 = vmatprep.subr.bf16.mxu0 %v710_v0 }
  0x88   :  { %546 = vmatpush3.bf16.msra.mxu0 %v583_v33 }
 0x13e   :  { %v187_v23 = vpop.f32.mrb[0].mxu0 }
 0x13f   :  { %v188_v24 = vadd.f32 %v437_v22, %v187_v23  ;;  %v509_v25 = vpop.f32.mrb[1].mxu0 }
 0x140   :  { %v190_v26 = vpop.f32.mrb[2].mxu0 }
 0x141   :  { %v193_v27 = vmax.f32 %v188_v24, 0.0  ;;  %v510_v28 = vpop.f32.mrb[3].mxu0 }
 0x143   :  { %v211_v29 = vpack.c.bf16 %v193_v27, %v193_v27 }
 0x145   :  { %528 = vmatmul.mubr.bf16.vlgmr.msra.gmra.mrb[0].mxu1 %v211_v29 }
 0x218   :  { %v300_v35 = vpop.f32.mrb[0].mxu1 }
 0x219   :  { %v301_v36 = vadd.f32 %v446_v34, %v300_v35  ;;  %v529_v37 = vpop.f32.mrb[1].mxu1 }
 0x21a   :  { %v303_v38 = vpop.f32.mrb[2].mxu1 }
 0x21b   :  { %584 = vtanh.f32 %v301_v36  ;;  %v530_v39 = vpop.f32.mrb[3].mxu1 }
 0x225   :  { %v585_v40 = vpop.eup %584 }
 0x226   :  { %v324_v41 = vpack.c.bf16 %v585_v40, %v585_v40 }
 0x228   :  { %548 = vmatmul.mubr.bf16.vlgmr.msra.gmra.mrb[4].mxu0 %v324_v41 }
 0x2fb   :  { %v413_v43 = vpop.f32.mrb[4].mxu0 }
 0x2fc   :  { %v414_v44 = vadd.f32 %v455_v42, %v413_v43  ;;  %v549_v45 = vpop.f32.mrb[5].mxu0 }
 0x2fd   :  { %v416_v46 = vpop.f32.mrb[6].mxu0 }
 0x2fe   :  { %419 = vst [vmem:[#allocation10] sm:$0xff] %v414_v44  ;;  %v550_v47 = vpop.f32.mrb[7].mxu0 }
 0x2ff   :  { %685 = shalt.err (!%p682_p8)
}
 0x300   :  { %s686_s6 = scalar_lea.hbm %s868_s7, 128 }
 0x301   :  { %p687_p9 = scmp.ne.s32.totalorder %s868_s7, %s686_s6  ;;  %p690_p10 = scmp.lt.u32.totalorder %s686_s6, %s868_s7 }
 0x303   :  { %p692_p11 = pnand %p690_p10, %p687_p9 }
 0x305   :  { %695 = shalt.err (!%p692_p11)
}
 0x306   :  { %429 = dma.vmem_to_hbm [thread:$0]  %s427_s29, 128, %s868_s7, [#allocation4]  }
 0x307   :  { %702 = dma.done.wait [#allocation4], 128  }
 0x308   :  { %703 = vsyncadd [#allocation4], 4294967168 }
 0x309   :  { %433 = vsyncpa [#allocation3], 1 }
 0x30a   :  { %434 = vsyncpa [#allocation6], 1 }
 0x30b   :  { %435 = vsyncpa [#allocation9], 1 }
 0x30c   :  { %436 = vsyncpa [#allocation4], 1 }

</bundles_post_ra>
